<compile_context>
chip_gen: v6e
topology: v6e:2x2x1
jax: 0.10.0
libtpu: 0.0.40
codegen_flags: <defaults>
</compile_context>

<pallas_src>
import functools

import jax
import jax.numpy as jnp
from jax import lax
from jax.experimental import pallas as pl
from jax.experimental.pallas import tpu as pltpu


def _mm_last(x3, w2):
    """(TB, T, D) @ (D, N) -> (TB, T, N) in f32 on the MXU."""
    TB, T, D = x3.shape
    N = w2.shape[1]
    if T % 8 == 0:
        # free leading-dim merge (T is a multiple of the f32 sublane tile)
        return jnp.dot(x3.reshape(TB * T, D), w2,
                       preferred_element_type=jnp.float32).reshape(TB, T, N)
    # TODO(synk): T not a multiple of 8 -> keep the contraction 3-D (may cost a
    # relayout); pad T in the wrapper if this path ever becomes hot.
    return lax.dot_general(x3, w2, (((2,), (0,)), ((), ())),
                           preferred_element_type=jnp.float32)


def _attention_agg_kernel(x_ref, w_ref, o_ref, *, fuse_mean):
    # x_ref: (TB, T, D) VMEM tile (TB batch elements, full track + feature dims)
    # w_ref: (D, 2D) resident = [w_top + bias | w_bot + bias]
    # o_ref: (TB, D)
    x = x_ref[...]                                   # (TB, T, D) f32
    TB, T, D = x.shape

    if fuse_mean:
        # One N=2D matmul; mean(x) @ w_bot == mean(x @ w_bot) by linearity.
        a_both = _mm_last(x, w_ref[...])             # (TB, T, 2D)
        a = a_both[..., :D] + jnp.mean(a_both[..., D:], axis=1, keepdims=True)
    else:
        # v5-class: keep two f32 matmuls (avoid doubling MXU passes).
        wt = w_ref[:, :D]                            # (D, D)
        wb = w_ref[:, D:]                            # (D, D)
        a_x = _mm_last(x, wt)                        # (TB, T, D)
        mean = jnp.mean(x, axis=1)                   # (TB, D)
        a_m = jnp.dot(mean, wb, preferred_element_type=jnp.float32)  # (TB, D)
        a = a_x + a_m[:, None, :]

    # softmax over the track axis; normalization deferred past the track-sum
    a_max = jnp.max(a, axis=1, keepdims=True)        # (TB, 1, D)
    p = jnp.exp(a - a_max)                           # (TB, T, D)
    denom = jnp.sum(p, axis=1)                       # (TB, D)
    y = jnp.sum(x * p, axis=1) * pl.reciprocal(denom, approx=True)   # (TB, D)

    # L2 normalize along D (torch F.normalize p=2, eps=1e-12)
    ss = jnp.sum(y * y, axis=1, keepdims=True)       # (TB, 1)
    y = y * lax.rsqrt(jnp.maximum(ss, 1e-24))

    o_ref[...] = y.astype(o_ref.dtype)


def _pick_tb(B, T, D, itemsize=4,
             block_budget_bytes=2 * 1024 * 1024, prefer_min_grid=2):
    """Largest batch block: divisor of B, multiple of 8 (sublane-aligned rows),
    x-block within the VMEM budget, preferring grid >= 2 (v7x dual-TC)."""
    divs = [d for d in range(1, B + 1) if B % d == 0 and (d % 8 == 0 or d == B)]
    if not divs:
        divs = [B]
    fitting = [d for d in divs if d * T * D * itemsize <= block_budget_bytes]
    if not fitting:
        fitting = [min(divs)]
    multi = [d for d in fitting if B // d >= prefer_min_grid]
    return max(multi) if multi else max(fitting)


def _device_is_v5():
    try:
        return "v5" in jax.devices()[0].device_kind.lower()
    except Exception:
        return False


def attention_aggregator(x, w, bias, tb=None):
    """x: (B, T, D) f32; w: (2D, D) f32; bias: python scalar. Returns (B, D) f32."""
    x = jnp.asarray(x, jnp.float32)
    B, T, D = x.shape
    w = jnp.asarray(w, jnp.float32)
    assert w.shape == (2 * D, D)

    # Fold the scalar bias into the weights once at trace time and pack the two
    # halves side-by-side as a single (D, 2D) lane-aligned resident.
    b = jnp.float32(float(bias))
    w_cat = jnp.concatenate([w[:D, :] + b, w[D:, :] + b], axis=1)   # (D, 2D)

    if tb is None:
        tb = _pick_tb(B, T, D)
    assert B % tb == 0, f"batch {B} must be divisible by block {tb}"

    fuse_mean = not _device_is_v5()
    kernel = functools.partial(_attention_agg_kernel, fuse_mean=fuse_mean)

    # VMEM budget: double-buffered x block + resident weights + output +
    # ~4x-block of live intermediates, with 2x headroom, capped for v7x (64 MiB).
    x_block = tb * T * D * 4
    vmem_est = 2 * x_block + 2 * (D * 2 * D * 4) + 2 * (tb * D * 4) + 4 * x_block
    vmem_limit = int(min(max(2 * vmem_est, 32 * 1024 * 1024), 48 * 1024 * 1024))

    return pl.pallas_call(
        kernel,
        out_shape=jax.ShapeDtypeStruct((B, D), jnp.float32),
        grid_spec=pltpu.PrefetchScalarGridSpec(
            num_scalar_prefetch=0,
            grid=(B // tb,),
            in_specs=[
                pl.BlockSpec((tb, T, D), lambda i: (i, 0, 0)),    # x batch block
                pl.BlockSpec((D, 2 * D), lambda i: (0, 0)),       # weights (resident)
            ],
            out_specs=pl.BlockSpec((tb, D), lambda i: (i, 0)),
        ),
        compiler_params=pltpu.CompilerParams(
            dimension_semantics=("parallel",),
            vmem_limit_bytes=vmem_limit,
        ),
    )(x, w_cat)


def _reference(x, w, bias):
    # Pure-JAX reference mirroring the PyTorch forward.
    means = jnp.mean(x, axis=1, keepdims=True)
    means = jnp.broadcast_to(means, x.shape)
    full = jnp.concatenate([x, means], axis=2)
    a = full @ (w + bias)
    a = jax.nn.softmax(a, axis=1)
    y = jnp.sum(x * a, axis=1)
    n = jnp.sqrt(jnp.sum(y * y, axis=1, keepdims=True))
    return y / jnp.maximum(n, 1e-12)


if __name__ == "__main__":
    # batch, track/img_count, latent_dim (module default latent_dim=128)
    B, T, D = 16, 8, 128

    key = jax.random.PRNGKey(0)
    kx, kw = jax.random.split(key)
    x = jax.random.normal(kx, (B, T, D), dtype=jnp.float32)
    # matches: w = 1 - randn(2D, D) * 0.99 ; bias = 1.0 (non-trainable scalar)
    w = 1.0 - jax.random.normal(kw, (2 * D, D), dtype=jnp.float32) * 0.99
    bias = 1.0

    ref = _reference(x, w, bias)

    # Auto block pick: tb=8 -> grid=(2,) (keeps both TCs busy on v7x).
    out = jax.block_until_ready(attention_aggregator(x, w, bias))
    assert out.shape == (B, D)
    assert jnp.allclose(out, ref, atol=1e-3, rtol=1e-3), \
        float(jnp.max(jnp.abs(out - ref)))

    # Explicit whole-batch block (single-step grid) also works.
    out2 = jax.block_until_ready(attention_aggregator(x, w, bias, tb=16))
    assert jnp.allclose(out2, ref, atol=1e-3, rtol=1e-3)

    print("KERNEL_OK")
</pallas_src>

<mosaic_0001>
module attributes {stable_mosaic.version = 11 : i64} {
  func.func @_attention_agg_kernel(%arg0: i32, %arg1: memref<8x8x128xf32, #tpu.memory_space<vmem>>, %arg2: memref<128x256xf32, #tpu.memory_space<vmem>>, %arg3: memref<8x128xf32, #tpu.memory_space<vmem>>) attributes {dimension_semantics = [#tpu.dimension_semantics<parallel>], iteration_bounds = array<i64: 2>, scalar_prefetch = 0 : i64, scratch_operands = 0 : i64, tpu.core_type = #tpu.core_type<tc>, window_params = [{transform_indices = @transform_0, window_bounds = array<i64: 8, 8, 128>}, {pipeline_mode = #tpu.pipeline_mode<synchronous>, transform_indices = @transform_1, window_bounds = array<i64: 128, 256>}, {transform_indices = @transform_2, window_bounds = array<i64: 8, 128>}]} {
    %c0 = arith.constant 0 : index
    %c0_0 = arith.constant 0 : index
    %c0_1 = arith.constant 0 : index
    %0 = vector.load %arg1[%c0, %c0_0, %c0_1] : memref<8x8x128xf32, #tpu.memory_space<vmem>>, vector<8x8x128xf32>
    %c0_2 = arith.constant 0 : index
    %c0_3 = arith.constant 0 : index
    %1 = vector.load %arg2[%c0_2, %c0_3] : memref<128x256xf32, #tpu.memory_space<vmem>>, vector<128x256xf32>
    %2 = vector.shape_cast %0 : vector<8x8x128xf32> to vector<64x128xf32>
    %cst = arith.constant dense<0.000000e+00> : vector<64x256xf32>
    %3 = tpu.matmul %2, %1, %cst {dimension_numbers = #tpu.dot_dimension_numbers<[1], [0], [0], [1], [0, 0, 1, 1], [], []>} : vector<64x128xf32>, vector<128x256xf32>, vector<64x256xf32> -> vector<64x256xf32>
    %4 = vector.shape_cast %3 : vector<64x256xf32> to vector<8x8x256xf32>
    %5 = vector.extract_strided_slice %4 {offsets = [0, 0, 0], sizes = [8, 8, 128], strides = [1, 1, 1]} : vector<8x8x256xf32> to vector<8x8x128xf32>
    %6 = vector.extract_strided_slice %4 {offsets = [0, 0, 128], sizes = [8, 8, 128], strides = [1, 1, 1]} : vector<8x8x256xf32> to vector<8x8x128xf32>
    %cst_4 = arith.constant dense<0.000000e+00> : vector<8x128xf32>
    %7 = vector.multi_reduction <add>, %6, %cst_4 [1] : vector<8x8x128xf32> to vector<8x128xf32>
    %8 = vector.shape_cast %7 : vector<8x128xf32> to vector<8x1x128xf32>
    %cst_5 = arith.constant 8.000000e+00 : f32
    %9 = vector.broadcast %cst_5 : f32 to vector<8x1x128xf32>
    %10 = arith.divf %8, %9 : vector<8x1x128xf32>
    %11 = vector.broadcast %10 : vector<8x1x128xf32> to vector<8x8x128xf32>
    %12 = arith.addf %5, %11 : vector<8x8x128xf32>
    %cst_6 = arith.constant dense<0xFF800000> : vector<8x128xf32>
    %13 = vector.multi_reduction <maximumf>, %12, %cst_6 [1] : vector<8x8x128xf32> to vector<8x128xf32>
    %14 = vector.shape_cast %13 : vector<8x128xf32> to vector<8x1x128xf32>
    %15 = vector.broadcast %14 : vector<8x1x128xf32> to vector<8x8x128xf32>
    %16 = arith.subf %12, %15 : vector<8x8x128xf32>
    %17 = math.exp %16 : vector<8x8x128xf32>
    %cst_7 = arith.constant dense<0.000000e+00> : vector<8x128xf32>
    %18 = vector.multi_reduction <add>, %17, %cst_7 [1] : vector<8x8x128xf32> to vector<8x128xf32>
    %19 = arith.mulf %0, %17 : vector<8x8x128xf32>
    %cst_8 = arith.constant dense<0.000000e+00> : vector<8x128xf32>
    %20 = vector.multi_reduction <add>, %19, %cst_8 [1] : vector<8x8x128xf32> to vector<8x128xf32>
    %21 = tpu.reciprocal %18 {approx = true} : vector<8x128xf32> -> vector<8x128xf32>
    %22 = arith.mulf %20, %21 : vector<8x128xf32>
    %23 = arith.mulf %22, %22 : vector<8x128xf32>
    %cst_9 = arith.constant dense<0.000000e+00> : vector<8xf32>
    %24 = vector.multi_reduction <add>, %23, %cst_9 [1] : vector<8x128xf32> to vector<8xf32>
    %25 = vector.shape_cast %24 : vector<8xf32> to vector<8x1xf32>
    %cst_10 = arith.constant 1.000000e-24 : f32
    %26 = vector.broadcast %cst_10 : f32 to vector<8x1xf32>
    %27 = arith.maximumf %25, %26 : vector<8x1xf32>
    %28 = math.rsqrt %27 : vector<8x1xf32>
    %29 = vector.broadcast %28 : vector<8x1xf32> to vector<8x128xf32>
    %30 = arith.mulf %22, %29 : vector<8x128xf32>
    %c0_11 = arith.constant 0 : index
    %c0_12 = arith.constant 0 : index
    %31 = vector.load %arg3[%c0_11, %c0_12] : memref<8x128xf32, #tpu.memory_space<vmem>>, vector<8x128xf32>
    tpu.vector_store %arg3[%c0_11, %c0_12], %30 {strides = array<i32>} : memref<8x128xf32, #tpu.memory_space<vmem>>, vector<8x128xf32>,
    return
  }
  func.func @transform_0(%arg0: i32) -> (i32, i32, i32) {
    %c0_i32 = arith.constant 0 : i32
    %c0_i32_0 = arith.constant 0 : i32
    %c0_i32_1 = arith.constant 0 : i32
    return %arg0, %c0_i32, %c0_i32_0 : i32, i32, i32
  }
  func.func @transform_1(%arg0: i32) -> (i32, i32) {
    %c0_i32 = arith.constant 0 : i32
    %c0_i32_0 = arith.constant 0 : i32
    %c0_i32_1 = arith.constant 0 : i32
    return %c0_i32, %c0_i32_0 : i32, i32
  }
  func.func @transform_2(%arg0: i32) -> (i32, i32) {
    %c0_i32 = arith.constant 0 : i32
    %c0_i32_0 = arith.constant 0 : i32
    return %arg0, %c0_i32 : i32, i32
  }
}

</mosaic_0001>

<bundles_post_ra>
// kernel: tpu_custom_call.1
= control target key start
LH: loop header
LB: loop body
LE: loop exit
PB: predicated region body
PF: predicated region fallthrough
CT: control target
= control target key end

     0   :  { %7 = vsyncpa [#allocation3], 0  ;;  %s1316_s0 = inlined_call_operand.hbm [shape: f32[16,8,128], index: 0, kind: input, shape index: {}]   ;;  %s1317_s1 = inlined_call_operand.hbm [shape: f32[128,256], index: 1, kind: input, shape index: {}]   ;;  %s1318_s2 = inlined_call_operand.hbm [shape: f32[16,128], index: 2, kind: output, shape index: {}]  }
   0x1   :  { %9 = vsyncpa [#allocation3 + $0x1], 0 }
   0x2   :  { %10 = vsyncpa [#allocation6], 0 }
   0x3   :  { %11 = vsyncpa [#allocation4], 0 }
   0x4   :  { %13 = vsyncpa [#allocation4 + $0x1], 0  ;;  %s1056_s9 = smov 0   ;;  %s1058_s10 = smov 0  }
   0x5   :  { %s1060_s11 = smov 0   ;;  %s1062_s12 = smov 0  }
   0x6 LB: > { %s1077_s13 = sadd.s32 4294967295, %s1031_s12   ;;  %s765_s14 = sadd.s32 4294967294, %s1031_s12   ;;  %s1031_s12 = sphi %s1062_s12, %s1340_s12   ;;  %s1027_s11 = sphi %s1060_s11, %s1339_s11   ;;  %s1023_s10 = sphi %s1058_s10, %s1338_s10   ;;  %s1019_s9 = sphi %s1056_s9, %s1337_s9  }
   0x7   : > { %p39_p0 = scmp.ne.s32.totalorder %s1023_s10, %s1019_s9  ;;  %p1319_p1 = scmp.eq.s32.totalorder %s1077_s13, 0 }
   0x8   : > { %p90_p3 = scmp.eq.s32.totalorder %s765_s14, 1  ;;  %p766_p5 = scmp.ge.s32.totalorder %s1031_s12, 1 }
   0x9   : > { %p1086_p4 = por %p1319_p1, %p39_p0  ;;  %p97_p7 = scmp.lt.s32.totalorder %s1031_s12, 3 }
   0xa   : > { %p1091_p6 = por %p90_p3, %p39_p0  ;;  %s1033_s18 = smov [#allocation5]  }
   0xb   : > { %s1323_s15 = scalar_select %p1086_p4, 1, 0 }
   0xc   : > { %s1324_s16 = scalar_select %p1091_p6, 1, 0 }
   0xd   : > { %p1096_p8 = pnand %p766_p5, %p97_p7  ;;  %s109_s19 = sshll.u32 %s1033_s18, 4  ;;  %s110_s19 = int_to_ptr.vmem [resolvable:$true] %s109_s19 }
   0xe   : > { %s1110_s21 = sadd.s32 1, %s1031_s12   ;;  %s26_s22 = sadd.s32 1, %s1027_s11 }
   0xf   : > { %s1325_s17 = scalar_select %p1096_p8, 1, 0 }
  0x10   : > { %p821_p9 = pneg %p1096_p8  ;;  %s23_s23 = ssub.s32 %s1031_s12, %s1110_s21 }
  0x11   : > { %s920_s24 = scalar_lea.vmem %s110_s19, 4096  ;;  %p928_p5 = scmp.lt.s32.totalorder %s110_s19, %s110_s19 }
  0x12   : > { %p1105_p11 = pnand %p821_p9, %p1319_p1  ;;  %p921_p13 = scmp.ne.s32.totalorder %s110_s19, %s920_s24 }
  0x13   : > { %p929_p7 = scmp.lt.s32.totalorder %s920_s24, %s920_s24 }
  0x14   : > { %p911_p12 = pneg %p1105_p11 }
  0x15   : > { %p930_p10 = por %p929_p7, %p928_p5 }
  0x16   : > { %p923_p0 = pnand %p921_p13, %p911_p12 }
  0x18   : > { %p924_p3 = pneg %p923_p0 }
  0x1a   : > { %p931_p2 = pnand %p930_p10, %p924_p3 }
  0x1c   : > { %934 = shalt.err (!%p931_p2)
}
  0x1d   : > { %s1034_s25 = smov 256   ;;  %s1035_s26 = smov 16  }
  0x1e   : > { %824 = dma.hbm_to_vmem [thread:$0]  (!%p1105_p11), %s1317_s1, 4096, %s110_s19, [#allocation6], %s1034_s25, %s1034_s25, %s1035_s26  }
  0x1f   : > { %p24_p9 = scmp.eq.s32.totalorder %s23_s23, 0  ;;  %p33_p12 = scmp.ne.s32.totalorder %s1027_s11, %s1023_s10 }
  0x20   : > { %p34_p10 = scmp.eq.s32.totalorder %s1031_s12, 0  ;;  %p834_p2 = scmp.lt.s32.totalorder %s1031_s12, 2 }
  0x21   : > { %s1127_s29 = scalar_select %p24_p9, %s1027_s11, %s26_s22  }
  0x22   : > { %p35_p13 = por %p34_p10, %p33_p12  ;;  %p1327_p0 = scmp.eq.s32.totalorder %s1077_s13, 1 }
  0x23   : > { %s123_s3 = sand.u32 1, %s1027_s11   ;;  %s780_s4 = sshll.u32 %s1031_s12, 10 }
  0x24   : > { %p1131_p3 = por %p1327_p0, %p33_p12  ;;  %s769_s5 = sshll.u32 %s123_s3, 6 }
  0x25   : > { %s1140_s8 = scalar_lea.hbm %s1316_s0, %s780_s4  ;;  %s127_s14 = scalar_lea.vmem [#allocation2], %s769_s5 }
  0x26   : > { %s1328_s30 = scalar_select %p1131_p3, 1, 0 }
  0x27   : > { %s134_s18 = sshll.u32 %s127_s14, 4  ;;  %p1142_p11 = pnand %p834_p2, %p35_p13  ;;  %s1146_s18 = int_to_ptr.vmem [resolvable:$true] %s134_s18 }
  0x28   : > { %s1148_s20 = scalar_lea.sflag [#allocation3], %s123_s3  ;;  %s935_s22 = scalar_lea.hbm %s1140_s8, 1024 }
  0x29   : > { %p936_p5 = scmp.ne.s32.totalorder %s1140_s8, %s935_s22  ;;  %p937_p7 = pneg %p1142_p11 }
  0x2a   : > { %s940_s25 = scalar_lea.hbm %s1316_s0, 2048  ;;  %p941_p10 = scmp.lt.s32.totalorder %s1140_s8, %s1316_s0 }
  0x2b   : > { %p938_p9 = pnand %p937_p7, %p936_p5  ;;  %p942_p2 = scmp.lt.s32.totalorder %s940_s25, %s935_s22 }
  0x2d   : > { %p939_p12 = pneg %p938_p9  ;;  %p943_p13 = por %p942_p2, %p941_p10 }
  0x2f   : > { %p944_p0 = pnand %p943_p13, %p939_p12 }
  0x31   : > { %947 = shalt.err (!%p944_p0)
}
  0x32   : > { %s948_s28 = scalar_lea.vmem %s1146_s18, 1024  ;;  %s1036_s3 = smov [#allocation2]  }
  0x33   : > { %p949_p1 = scmp.ne.s32.totalorder %s1146_s18, %s948_s28  ;;  %s953_s4 = sshll.u32 %s1036_s3, 4  ;;  %s954_s4 = int_to_ptr.vmem [resolvable:$false] %s953_s4 }
  0x34   : > { %s955_s5 = scalar_lea.vmem %s954_s4, 2048  ;;  %p956_p9 = scmp.lt.s32.totalorder %s1146_s18, %s954_s4 }
  0x35   : > { %p951_p6 = pnand %p949_p1, %p937_p7  ;;  %p957_p3 = scmp.lt.s32.totalorder %s955_s5, %s948_s28 }
  0x37   : > { %p952_p5 = pneg %p951_p6  ;;  %p958_p4 = por %p957_p3, %p956_p9 }
  0x39   : > { %p959_p8 = pnand %p958_p4, %p952_p5 }
  0x3b   : > { %962 = shalt.err (!%p959_p8)
}
  0x3c   : > { %s1037_s6 = smov 128   ;;  %s1038_s7 = smov 8  }
  0x3d   : > { %828 = dma.hbm_to_vmem [thread:$0]  (!%p1142_p11), %s1140_s8, 1024, %s1146_s18, %s1148_s20, %s1037_s6, %s1037_s6, %s1038_s7  }
  0x3e   : > { %p1330_p1 = scmp.ne.s32.totalorder %s1325_s17, 0 }
  0x3f   : > { %s1172_s14 = sand.u32 (!%p1330_p1), 1, %s1023_s10   ;;  %p1331_p4 = scmp.ne.s32.totalorder (!%p1330_p1), %s1323_s15, 0 }
  0x40   : > { %146 = sbr.rel (%p1330_p1) target bundleno = 576 (0x240), region = 28  ;;  %s773_s22 = sshll.u32 (!%p1330_p1), %s1172_s14, 6 }
  0x41   : > { %s149_s23 = scalar_lea.sflag (!%p1330_p1), [#allocation3], %s1172_s14  ;;  %s1176_s24 = scalar_lea.vmem (!%p1330_p1), [#allocation2], %s773_s22 }
  0x45   : > { %1006 = dma.done.wait (%p1331_p4), %s149_s23, 1024  }
  0x46   : > { %1008 = vsyncadd (%p1331_p4), %s149_s23, 4294966272  ;;  %p1332_p6 = scmp.eq.s32.totalorder %s1077_s13, 0 }
  0x48   : > { %1010 = dma.done.wait (%p1332_p6), [#allocation6], 4096   ;;  %p1333_p8 = pmov %p1332_p6 }
  0x49   : > { %v1039_v0 = vmov 0.0   ;;  %v217_v1 = vld [vmem:[#allocation5 + $0xf8] sm:$0xff]  ;;  %v216_v2 = vld [vmem:[#allocation5 + $0xf0] sm:$0xff]  ;;  %v215_v3 = vld [vmem:[#allocation5 + $0xe8] sm:$0xff]  ;;  %vm604_vm0 = vcmask 1041409   ;;  %vm606_vm1 = vcmask 1042434  }
  0x4a   : > { %1012 = vsyncadd (%p1333_p8), [#allocation6], 4294963200  ;;  %282 = vmatprep.mubr.f32.mxu0 %v1039_v0  ;;  %306 = vmatprep.mubr.f32.mxu1 %v1039_v0  ;;  %v214_v4 = vld [vmem:[#allocation5 + $0xe0] sm:$0xff]  ;;  %v213_v5 = vld [vmem:[#allocation5 + $0xd8] sm:$0xff]  ;;  %vm608_vm2 = vcmask 1043459   ;;  %vm610_vm3 = vcmask 1044484  }
  0x4b   : > { %218 = vmatprep.subr.mxu0 %v217_v1  ;;  %781 = vmatprep.subr.mxu1 %v217_v1  ;;  %v212_v6 = vld [vmem:[#allocation5 + $0xd0] sm:$0xff]  ;;  %v211_v7 = vld [vmem:[#allocation5 + $0xc8] sm:$0xff]  ;;  %v210_v8 = vld [vmem:[#allocation5 + $0xc0] sm:$0xff]  ;;  %vm612_vm4 = vcmask 1045509   ;;  %vm614_vm5 = vcmask 1046534   ;;  %vm616_vm6 = vcmask 1047559  }
  0x4c   : > { %219 = vmatpush1.msra.mxu0 %v216_v2  ;;  %797 = vmatpush1.msra.mxu1 %v216_v2  ;;  %v209_v9 = vld [vmem:[#allocation5 + $0xb8] sm:$0xff]  ;;  %v208_v10 = vld [vmem:[#allocation5 + $0xb0] sm:$0xff]  ;;  %v207_v11 = vld [vmem:[#allocation5 + $0xa8] sm:$0xff]  ;;  %s775_s15 = sshll.u32 %s1172_s14, 3  ;;  %s777_s17 = sshll.u32 %s1077_s13, 7 }
  0x4d   : > { %220 = vmatprep.subr.mxu0 %v215_v3  ;;  %782 = vmatprep.subr.mxu1 %v215_v3  ;;  %v206_v12 = vld [vmem:[#allocation5 + $0xa0] sm:$0xff]  ;;  %v205_v13 = vld [vmem:[#allocation5 + $0x98] sm:$0xff]  ;;  %v204_v14 = vld [vmem:[#allocation5 + $0x90] sm:$0xff]  ;;  %s176_s8 = scalar_lea.vmem [#allocation7], %s775_s15  ;;  %s1278_s25 = scalar_lea.hbm %s1318_s2, %s777_s17 }
  0x4e   : > { %221 = vmatpush1.msra.mxu0 %v214_v4  ;;  %798 = vmatpush1.msra.mxu1 %v214_v4  ;;  %v203_v15 = vld [vmem:[#allocation5 + $0x88] sm:$0xff]  ;;  %v202_v16 = vld [vmem:[#allocation5 + $0x80] sm:$0xff]  ;;  %v201_v17 = vld [vmem:[#allocation5 + $0x78] sm:$0xff]  ;;  %s685_s18 = sshll.u32 %s176_s8, 4  ;;  %s672_s13 = scalar_lea.sflag [#allocation4], %s1172_s14  ;;  %s686_s18 = int_to_ptr.vmem [resolvable:$true] %s685_s18 }
  0x4f   : > { %222 = vmatprep.subr.mxu0 %v213_v5  ;;  %783 = vmatprep.subr.mxu1 %v213_v5  ;;  %v200_v18 = vld [vmem:[#allocation5 + $0x70] sm:$0xff]  ;;  %v199_v19 = vld [vmem:[#allocation5 + $0x68] sm:$0xff]  ;;  %v198_v20 = vld [vmem:[#allocation5 + $0x60] sm:$0xff]  ;;  %s963_s26 = scalar_lea.vmem %s686_s18, 128  ;;  %p1334_p11 = scmp.ne.s32.totalorder %s1328_s30, 0 }
  0x50   : > { %223 = vmatpush1.msra.mxu0 %v212_v6  ;;  %799 = vmatpush1.msra.mxu1 %v212_v6  ;;  %v197_v21 = vld [vmem:[#allocation5 + $0x58] sm:$0xff]  ;;  %v196_v22 = vld [vmem:[#allocation5 + $0x50] sm:$0xff]  ;;  %v195_v23 = vld [vmem:[#allocation5 + $0x48] sm:$0xff]  ;;  %p964_p3 = scmp.ne.s32.totalorder %s686_s18, %s963_s26  ;;  %s1040_s27 = smov [#allocation7]  }
  0x51   : > { %224 = vmatprep.subr.mxu0 %v211_v7  ;;  %784 = vmatprep.subr.mxu1 %v211_v7  ;;  %v194_v24 = vld [vmem:[#allocation5 + $0x40] sm:$0xff]  ;;  %v193_v25 = vld [vmem:[#allocation5 + $0x38] sm:$0xff]  ;;  %v192_v26 = vld [vmem:[#allocation5 + $0x30] sm:$0xff]  ;;  %s967_s28 = sshll.u32 %s1040_s27, 4  ;;  %s968_s28 = int_to_ptr.vmem [resolvable:$false] %s967_s28 }
  0x52   : > { %225 = vmatpush1.msra.mxu0 %v210_v8  ;;  %800 = vmatpush1.msra.mxu1 %v210_v8  ;;  %v191_v27 = vld [vmem:[#allocation5 + $0x28] sm:$0xff]  ;;  %v190_v28 = vld [vmem:[#allocation5 + $0x20] sm:$0xff]  ;;  %v189_v29 = vld [vmem:[#allocation5 + $0x18] sm:$0xff]  ;;  %p965_p7 = pnand %p964_p3, %p1334_p11  ;;  %s969_s3 = scalar_lea.vmem %s968_s28, 256 }
  0x53   : > { %226 = vmatprep.subr.mxu0 %v209_v9  ;;  %785 = vmatprep.subr.mxu1 %v209_v9  ;;  %v188_v30 = vld [vmem:[#allocation5 + $0x10] sm:$0xff]  ;;  %v187_v31 = vld [vmem:[#allocation5 + $0x8] sm:$0xff]  ;;  %v186_v32 = vld [vmem:[#allocation5] sm:$0xff]  ;;  %p970_p10 = scmp.lt.s32.totalorder %s686_s18, %s968_s28  ;;  %p971_p2 = scmp.lt.s32.totalorder %s969_s3, %s963_s26 }
  0x54   : > { %227 = vmatpush1.msra.mxu0 %v208_v10  ;;  %801 = vmatpush1.msra.mxu1 %v208_v10  ;;  %v1189_v33 = vld [vmem:[%s1176_s24] sm:$0xff]  ;;  %v1199_v35 = vld [vmem:[%s1176_s24 + $0x8] sm:$0xff]  ;;  %v1209_v37 = vld [vmem:[%s1176_s24 + $0x10] sm:$0xff]  ;;  %p966_p12 = pneg %p965_p7 }
  0x55   : > { %228 = vmatprep.subr.mxu0 %v207_v11  ;;  %786 = vmatprep.subr.mxu1 %v207_v11  ;;  %v1192_v34 = vld [vmem:[%s1176_s24 + $0x20] sm:$0xff]  ;;  %v1202_v36 = vld [vmem:[%s1176_s24 + $0x28] sm:$0xff]  ;;  %v1212_v38 = vld [vmem:[%s1176_s24 + $0x30] sm:$0xff]  ;;  %p972_p13 = por %p971_p2, %p970_p10 }
  0x56   : > { %229 = vmatpush1.msra.mxu0 %v206_v12  ;;  %802 = vmatpush1.msra.mxu1 %v206_v12  ;;  %v1219_v39 = vld [vmem:[%s1176_s24 + $0x18] sm:$0xff] }
  0x57   : > { %230 = vmatprep.subr.mxu0 %v205_v13  ;;  %787 = vmatprep.subr.mxu1 %v205_v13  ;;  %v1222_v40 = vld [vmem:[%s1176_s24 + $0x38] sm:$0xff]  ;;  %p973_p0 = pnand %p972_p13, %p966_p12 }
  0x58   : > { %231 = vmatpush1.msra.mxu0 %v204_v14  ;;  %803 = vmatpush1.msra.mxu1 %v204_v14 }
  0x59   : > { %232 = vmatprep.subr.mxu0 %v203_v15  ;;  %788 = vmatprep.subr.mxu1 %v203_v15 }
  0x5a   : > { %233 = vmatpush1.msra.mxu0 %v202_v16  ;;  %804 = vmatpush1.msra.mxu1 %v202_v16 }
  0x5b   : > { %234 = vmatprep.subr.mxu0 %v201_v17  ;;  %789 = vmatprep.subr.mxu1 %v201_v17 }
  0x5c   : > { %235 = vmatpush1.msra.mxu0 %v200_v18  ;;  %805 = vmatpush1.msra.mxu1 %v200_v18 }
  0x5d   : > { %236 = vmatprep.subr.mxu0 %v199_v19  ;;  %790 = vmatprep.subr.mxu1 %v199_v19 }
  0x5e   : > { %237 = vmatpush1.msra.mxu0 %v198_v20  ;;  %806 = vmatpush1.msra.mxu1 %v198_v20 }
  0x5f   : > { %238 = vmatprep.subr.mxu0 %v197_v21  ;;  %791 = vmatprep.subr.mxu1 %v197_v21 }
  0x60   : > { %239 = vmatpush1.msra.mxu0 %v196_v22  ;;  %807 = vmatpush1.msra.mxu1 %v196_v22 }
  0x61   : > { %240 = vmatprep.subr.mxu0 %v195_v23  ;;  %792 = vmatprep.subr.mxu1 %v195_v23 }
  0x62   : > { %241 = vmatpush1.msra.mxu0 %v194_v24  ;;  %808 = vmatpush1.msra.mxu1 %v194_v24 }
  0x63   : > { %242 = vmatprep.subr.mxu0 %v193_v25  ;;  %793 = vmatprep.subr.mxu1 %v193_v25 }
  0x64   : > { %243 = vmatpush1.msra.mxu0 %v192_v26  ;;  %809 = vmatpush1.msra.mxu1 %v192_v26 }
  0x65   : > { %244 = vmatprep.subr.mxu0 %v191_v27  ;;  %794 = vmatprep.subr.mxu1 %v191_v27 }
  0x66   : > { %245 = vmatpush1.msra.mxu0 %v190_v28  ;;  %810 = vmatpush1.msra.mxu1 %v190_v28 }
  0x67   : > { %246 = vmatprep.subr.mxu0 %v189_v29  ;;  %795 = vmatprep.subr.mxu1 %v189_v29 }
  0x68   : > { %247 = vmatpush1.msra.mxu0 %v188_v30  ;;  %811 = vmatpush1.msra.mxu1 %v188_v30 }
  0x69   : > { %248 = vmatprep.subr.mxu0 %v187_v31  ;;  %796 = vmatprep.subr.mxu1 %v187_v31 }
  0x6a   : > { %249 = vmatpush1.msra.mxu0 %v186_v32  ;;  %812 = vmatpush1.msra.mxu1 %v186_v32 }
  0x6b   : > { %283 = vmatmul.mubr.f32.vlgmr.msra.gmra.mxu0 %v1189_v33  ;;  %307 = vmatmul.mubr.f32.vlgmr.msra.gmra.mxu1 %v1192_v34 }
  0x6c   : > { %288 = vmatprep.mubr.f32.mxu0 %v1039_v0  ;;  %312 = vmatprep.mubr.f32.mxu1 %v1039_v0 }
  0x6f   : > { %289 = vmatmul.mubr.f32.gmra.mxu0 %v1199_v35  ;;  %313 = vmatmul.mubr.f32.gmra.mxu1 %v1202_v36 }
  0x70   : > { %294 = vmatprep.mubr.f32.mxu0 %v1039_v0  ;;  %318 = vmatprep.mubr.f32.mxu1 %v1039_v0 }
  0x73   : > { %295 = vmatmul.mubr.f32.gmra.mxu0 %v1209_v37  ;;  %319 = vmatmul.mubr.f32.gmra.mxu1 %v1212_v38 }
  0x74   : > { %300 = vmatprep.mubr.f32.mxu0 %v1039_v0  ;;  %324 = vmatprep.mubr.f32.mxu1 %v1039_v0 }
  0x77   : > { %301 = vmatmul.mubr.f32.gmra.mxu0 %v1219_v39  ;;  %325 = vmatmul.mubr.f32.gmra.mxu1 %v1222_v40 }
 0x12b   : > { %v284_v41 = vpop.f32.mrf.mxu0  ;;  %v308_v42 = vpop.f32.mrf.mxu1 }
 0x12d   : > { %v286_v43 = vpop.f32.mrf.mxu0  ;;  %v310_v44 = vpop.f32.mrf.mxu1 }
 0x12e   : > { %v331_v45 = vrot.slane %v286_v43, 4  ;;  %v355_v46 = vrot.slane %v310_v44, 4 }
 0x12f   : > { %v290_v47 = vpop.f32.mrf.mxu0  ;;  %v314_v48 = vpop.f32.mrf.mxu1 }
 0x130   : > { %v332_v49 = vadd.f32 %v331_v45, %v286_v43  ;;  %v356_v50 = vadd.f32 %v355_v46, %v310_v44 }
 0x131   : > { %v292_v51 = vpop.f32.mrf.mxu0  ;;  %v316_v52 = vpop.f32.mrf.mxu1 }
 0x132   : > { %v333_v53 = vrot.slane %v332_v49, 2  ;;  %v357_v54 = vrot.slane %v356_v50, 2  ;;  %v337_v55 = vrot.slane %v292_v51, 4  ;;  %v361_v56 = vrot.slane %v316_v52, 4 }
 0x133   : > { %v1226_v57 = vpop.f32.mrf.mxu0  ;;  %v1228_v58 = vpop.f32.mrf.mxu1 }
 0x134   : > { %v334_v59 = vadd.f32 %v333_v53, %v332_v49  ;;  %v358_v60 = vadd.f32 %v357_v54, %v356_v50  ;;  %v338_v61 = vadd.f32 %v337_v55, %v292_v51  ;;  %v362_v62 = vadd.f32 %v361_v56, %v316_v52 }
 0x135   : > { %v298_v63 = vpop.f32.mrf.mxu0  ;;  %v322_v0 = vpop.f32.mrf.mxu1 }
 0x136   : > { %v335_v1 = vrot.slane %v334_v59, 1  ;;  %v359_v2 = vrot.slane %v358_v60, 1  ;;  %v339_v3 = vrot.slane %v338_v61, 2  ;;  %v363_v4 = vrot.slane %v362_v62, 2 }
 0x137   : > { %v343_v5 = vrot.slane %v298_v63, 4  ;;  %v367_v6 = vrot.slane %v322_v0, 4  ;;  %v1230_v7 = vpop.f32.mrf.mxu0  ;;  %v1232_v8 = vpop.f32.mrf.mxu1 }
 0x138   : > { %v336_v9 = vadd.f32 %v335_v1, %v334_v59  ;;  %v360_v10 = vadd.f32 %v359_v2, %v358_v60  ;;  %v340_v11 = vadd.f32 %v339_v3, %v338_v61  ;;  %v364_v12 = vadd.f32 %v363_v4, %v362_v62 }
 0x139   : > { %v344_v13 = vadd.f32 %v343_v5, %v298_v63  ;;  %v368_v14 = vadd.f32 %v367_v6, %v322_v0  ;;  %v304_v15 = vpop.f32.mrf.mxu0  ;;  %v328_v16 = vpop.f32.mrf.mxu1 }
 0x13a   : > { %v380_v17 = vmul.f32 0.125, %v336_v9  ;;  %v384_v18 = vmul.f32 0.125, %v360_v10  ;;  %v341_v19 = vrot.slane %v340_v11, 1  ;;  %v365_v20 = vrot.slane %v364_v12, 1 }
 0x13b   : > { %v345_v21 = vrot.slane %v344_v13, 2  ;;  %v369_v22 = vrot.slane %v368_v14, 2  ;;  %v349_v23 = vrot.slane %v304_v15, 4  ;;  %v373_v24 = vrot.slane %v328_v16, 4 }
 0x13c   : > { %v1234_v25 = vadd.f32 %v380_v17, %v284_v41  ;;  %v1236_v26 = vadd.f32 %v384_v18, %v308_v42  ;;  %v342_v27 = vadd.f32 %v341_v19, %v340_v11  ;;  %v366_v28 = vadd.f32 %v365_v20, %v364_v12 }
 0x13d   : > { %v346_v29 = vadd.f32 %v345_v21, %v344_v13  ;;  %v370_v30 = vadd.f32 %v369_v22, %v368_v14  ;;  %v350_v31 = vadd.f32 %v349_v23, %v304_v15  ;;  %v374_v32 = vadd.f32 %v373_v24, %v328_v16 }
 0x13e   : > { %v396_v43 = vrot.slane %v1234_v25, 4  ;;  %v420_v44 = vrot.slane %v1236_v26, 4  ;;  %v381_v45 = vmul.f32 0.125, %v342_v27  ;;  %v385_v46 = vmul.f32 0.125, %v366_v28 }
 0x13f   : > { %v347_v49 = vrot.slane %v346_v29, 1  ;;  %v371_v50 = vrot.slane %v370_v30, 1  ;;  %v351_v51 = vrot.slane %v350_v31, 2  ;;  %v375_v52 = vrot.slane %v374_v32, 2 }
 0x140   : > { %v397_v41 = vmax.f32 %v1234_v25, %v396_v43  ;;  %v421_v42 = vmax.f32 %v1236_v26, %v420_v44  ;;  %v389_v53 = vadd.f32 %v381_v45, %v290_v47  ;;  %v393_v54 = vadd.f32 %v385_v46, %v314_v48 }
 0x141   : > { %v348_v55 = vadd.f32 %v347_v49, %v346_v29  ;;  %v372_v56 = vadd.f32 %v371_v50, %v370_v30  ;;  %v352_v59 = vadd.f32 %v351_v51, %v350_v31  ;;  %v376_v60 = vadd.f32 %v375_v52, %v374_v32 }
 0x142   : > { %v398_v61 = vrot.slane %v397_v41, 2  ;;  %v422_v62 = vrot.slane %v421_v42, 2  ;;  %v402_v63 = vrot.slane %v389_v53, 4  ;;  %v426_v0 = vrot.slane %v393_v54, 4 }
 0x143   : > { %v382_v1 = vmul.f32 0.125, %v348_v55  ;;  %v386_v2 = vmul.f32 0.125, %v372_v56  ;;  %v353_v3 = vrot.slane %v352_v59, 1  ;;  %v377_v4 = vrot.slane %v376_v60, 1 }
 0x144   : > { %v399_v5 = vmax.f32 %v397_v41, %v398_v61  ;;  %v423_v6 = vmax.f32 %v421_v42, %v422_v62  ;;  %v403_v9 = vmax.f32 %v389_v53, %v402_v63  ;;  %v427_v10 = vmax.f32 %v393_v54, %v426_v0 }
 0x145   : > { %v390_v11 = vadd.f32 %v382_v1, %v1226_v57  ;;  %v394_v47 = vadd.f32 %v386_v2, %v1228_v58  ;;  %v354_v48 = vadd.f32 %v353_v3, %v352_v59  ;;  %v378_v12 = vadd.f32 %v377_v4, %v376_v60 }
 0x146   : > { %v400_v13 = vrot.slane %v399_v5, 1  ;;  %v424_v14 = vrot.slane %v423_v6, 1  ;;  %v404_v15 = vrot.slane %v403_v9, 2  ;;  %v428_v16 = vrot.slane %v427_v10, 2 }
 0x147   : > { %v408_v17 = vrot.slane %v390_v11, 4  ;;  %v432_v18 = vrot.slane %v394_v47, 4  ;;  %v383_v19 = vmul.f32 0.125, %v354_v48  ;;  %v387_v20 = vmul.f32 0.125, %v378_v12 }
 0x148   : > { %v401_v21 = vmax.f32 %v399_v5, %v400_v13  ;;  %v425_v22 = vmax.f32 %v423_v6, %v424_v14  ;;  %v405_v23 = vmax.f32 %v403_v9, %v404_v15  ;;  %v429_v24 = vmax.f32 %v427_v10, %v428_v16 }
 0x149   : > { %v409_v27 = vmax.f32 %v390_v11, %v408_v17  ;;  %v433_v28 = vmax.f32 %v394_v47, %v432_v18  ;;  %v391_v57 = vadd.f32 %v383_v19, %v1230_v7  ;;  %v395_v58 = vadd.f32 %v387_v20, %v1232_v8 }
 0x14a   : > { %v444_v29 = vsub.f32 %v1234_v25, %v401_v21  ;;  %v448_v30 = vsub.f32 %v1236_v26, %v425_v22  ;;  %v406_v31 = vrot.slane %v405_v23, 1  ;;  %v430_v32 = vrot.slane %v429_v24, 1 }
 0x14b   : > { %v410_v43 = vrot.slane %v409_v27, 2  ;;  %v434_v44 = vrot.slane %v433_v28, 2  ;;  %v414_v45 = vrot.slane %v391_v57, 4  ;;  %v438_v46 = vrot.slane %v395_v58, 4 }
 0x14c   : > { %v452_v49 = vmul.f32 1.442695, %v444_v29  ;;  %v460_v50 = vmul.f32 1.442695, %v448_v30  ;;  %v407_v51 = vmax.f32 %v405_v23, %v406_v31  ;;  %v431_v52 = vmax.f32 %v429_v24, %v430_v32 }
 0x14d   : > { %v411_v41 = vmax.f32 %v409_v27, %v410_v43  ;;  %v435_v42 = vmax.f32 %v433_v28, %v434_v44  ;;  %v415_v55 = vmax.f32 %v391_v57, %v414_v45  ;;  %v439_v7 = vmax.f32 %v395_v58, %v438_v46 }
 0x14e   : > { %875 = vpow2.f32 %v452_v49  ;;  %v445_v8 = vsub.f32 %v389_v53, %v407_v51  ;;  %v449_v56 = vsub.f32 %v393_v54, %v431_v52 }
 0x14f   : > { %v412_v25 = vrot.slane %v411_v41, 1  ;;  %v436_v59 = vrot.slane %v435_v42, 1  ;;  %v416_v26 = vrot.slane %v415_v55, 2  ;;  %877 = vpow2.f32 %v460_v50 }
 0x150   : > { %v454_v60 = vmul.f32 1.442695, %v445_v8  ;;  %v462_v61 = vmul.f32 1.442695, %v449_v56  ;;  %v440_v62 = vrot.slane %v439_v7, 2 }
 0x151   : > { %v413_v63 = vmax.f32 %v411_v41, %v412_v25  ;;  %v437_v0 = vmax.f32 %v435_v42, %v436_v59  ;;  %v417_v1 = vmax.f32 %v415_v55, %v416_v26 }
 0x152   : > { %879 = vpow2.f32 %v454_v60  ;;  %v441_v2 = vmax.f32 %v439_v7, %v440_v62 }
 0x153   : > { %881 = vpow2.f32 %v462_v61  ;;  %v446_v3 = vsub.f32 %v390_v11, %v413_v63  ;;  %v450_v4 = vsub.f32 %v394_v47, %v437_v0  ;;  %v418_v5 = vrot.slane %v417_v1, 1 }
 0x154   : > { %v442_v6 = vrot.slane %v441_v2, 1 }
 0x155   : > { %v456_v9 = vmul.f32 1.442695, %v446_v3  ;;  %v464_v53 = vmul.f32 1.442695, %v450_v4  ;;  %v419_v54 = vmax.f32 %v417_v1, %v418_v5 }
 0x156   : > { %v443_v10 = vmax.f32 %v441_v2, %v442_v6 }
 0x157   : > { %883 = vpow2.f32 %v456_v9  ;;  %v447_v48 = vsub.f32 %v391_v57, %v419_v54 }
 0x158   : > { %885 = vpow2.f32 %v464_v53  ;;  %v451_v12 = vsub.f32 %v395_v58, %v443_v10 }
 0x159   : > { %v458_v13 = vmul.f32 1.442695, %v447_v48 }
 0x15a   : > { %v466_v14 = vmul.f32 1.442695, %v451_v12 }
 0x15b   : > { %v876_v15 = vpop.eup %875  ;;  %887 = vpow2.f32 %v458_v13 }
 0x15c   : > { %889 = vpow2.f32 %v466_v14  ;;  %v468_v16 = vrot.slane %v876_v15, 4  ;;  %v878_v17 = vpop.eup %877  ;;  %v516_v23 = vmul.f32 %v876_v15, %v1189_v33 }
 0x15d   : > { %v492_v20 = vrot.slane %v878_v17, 4  ;;  %v1250_v27 = vmul.f32 %v878_v17, %v1192_v34 }
 0x15e   : > { %v469_v11 = vadd.f32 %v876_v15, %v468_v16  ;;  %v524_v43 = vrot.slane %v516_v23, 4 }
 0x15f   : > { %v880_v18 = vpop.eup %879  ;;  %v493_v57 = vadd.f32 %v878_v17, %v492_v20  ;;  %v548_v46 = vrot.slane %v1250_v27, 4 }
 0x160   : > { %v882_v47 = vpop.eup %881  ;;  %v474_v19 = vrot.slane %v880_v18, 4  ;;  %v470_v24 = vrot.slane %v469_v11, 2  ;;  %v517_v52 = vmul.f32 %v880_v18, %v1199_v35  ;;  %v525_v59 = vadd.f32 %v524_v43, %v516_v23 }
 0x161   : > { %v498_v21 = vrot.slane %v882_v47, 4  ;;  %v494_v50 = vrot.slane %v493_v57, 2  ;;  %v521_v62 = vmul.f32 %v882_v47, %v1202_v36 }
 0x162   : > { %v475_v22 = vadd.f32 %v880_v18, %v474_v19  ;;  %v471_v44 = vadd.f32 %v470_v24, %v469_v11  ;;  %v530_v1 = vrot.slane %v517_v52, 4  ;;  %v526_v48 = vrot.slane %v525_v59, 2 }
 0x163   : > { %v499_v58 = vadd.f32 %v882_v47, %v498_v21  ;;  %v495_v63 = vadd.f32 %v494_v50, %v493_v57  ;;  %v554_v14 = vrot.slane %v521_v62, 4 }
 0x164   : > { %v884_v28 = vpop.eup %883  ;;  %v476_v30 = vrot.slane %v475_v22, 2  ;;  %v472_v26 = vrot.slane %v471_v44, 1  ;;  %v531_v13 = vadd.f32 %v530_v1, %v517_v52  ;;  %v527_v24 = vadd.f32 %v526_v48, %v525_v59 }
 0x165   : > { %v886_v29 = vpop.eup %885  ;;  %v480_v31 = vrot.slane %v884_v28, 4  ;;  %v500_v51 = vrot.slane %v499_v58, 2  ;;  %v518_v7 = vmul.f32 %v884_v28, %v1209_v37  ;;  %v496_v12 = vrot.slane %v495_v63, 1 }
 0x166   : > { %v504_v32 = vrot.slane %v886_v29, 4  ;;  %v477_v41 = vadd.f32 %v476_v30, %v475_v22  ;;  %v522_v35 = vmul.f32 %v886_v29, %v1212_v38  ;;  %v532_v57 = vrot.slane %v531_v13, 2 }
 0x167   : > { %v481_v45 = vadd.f32 %v884_v28, %v480_v31  ;;  %v501_v4 = vadd.f32 %v500_v51, %v499_v58  ;;  %v536_v5 = vrot.slane %v518_v7, 4  ;;  %v497_v23 = vadd.f32 %v496_v12, %v495_v63 }
 0x168   : > { %v888_v49 = vpop.eup %887  ;;  %v505_v33 = vadd.f32 %v886_v29, %v504_v32  ;;  %v478_v2 = vrot.slane %v477_v41, 1  ;;  %v560_v19 = vrot.slane %v522_v35, 4  ;;  %v555_v58 = vadd.f32 %v554_v14, %v521_v62 }
 0x169   : > { %v890_v34 = vpop.eup %889  ;;  %v482_v42 = vrot.slane %v481_v45, 2  ;;  %v486_v55 = vrot.slane %v888_v49, 4  ;;  %v519_v25 = vmul.f32 %v888_v49, %v1219_v39  ;;  %v473_v39 = vadd.f32 %v472_v26, %v471_v44 }
 0x16a   : > { %v506_v8 = vrot.slane %v505_v33, 2  ;;  %v510_v56 = vrot.slane %v890_v34, 4  ;;  %v523_v10 = vmul.f32 %v890_v34, %v1222_v40  ;;  %v479_v15 = vadd.f32 %v478_v2, %v477_v41 }
 0x16b   : > { %v483_v60 = vadd.f32 %v482_v42, %v481_v45  ;;  %v487_v61 = vadd.f32 %v888_v49, %v486_v55  ;;  %v542_v53 = vrot.slane %v519_v25, 4  ;;  %v502_v16 = vrot.slane %v501_v4, 1 }
 0x16c   : > { %v511_v0 = vadd.f32 %v890_v34, %v510_v56  ;;  %v507_v6 = vadd.f32 %v506_v8, %v505_v33  ;;  %v537_v17 = vadd.f32 %v536_v5, %v518_v7  ;;  %v566_v22 = vrot.slane %v523_v10, 4 }
 0x16d   : > { %v488_v3 = vrot.slane %v487_v61, 2  ;;  %v484_v37 = vrot.slane %v483_v60, 1  ;;  %v543_v47 = vadd.f32 %v542_v53, %v519_v25  ;;  %891 = vrcp.f32 %v473_v39 }
 0x16e   : > { %v512_v9 = vrot.slane %v511_v0, 2  ;;  %v508_v11 = vrot.slane %v507_v6, 1  ;;  %v549_v40 = vadd.f32 %v548_v46, %v1250_v27  ;;  %v503_v28 = vadd.f32 %v502_v16, %v501_v4 }
 0x16f   : > { %v489_v54 = vadd.f32 %v488_v3, %v487_v61  ;;  %v485_v18 = vadd.f32 %v484_v37, %v483_v60  ;;  %893 = vrcp.f32 %v479_v15  ;;  %v538_v30 = vrot.slane %v537_v17, 2 }
 0x170   : > { %v513_v36 = vadd.f32 %v512_v9, %v511_v0  ;;  %v509_v29 = vadd.f32 %v508_v11, %v507_v6  ;;  %v561_v31 = vadd.f32 %v560_v19, %v522_v35  ;;  %v544_v43 = vrot.slane %v543_v47, 2 }
 0x171   : > { %v490_v38 = vrot.slane %v489_v54, 1  ;;  %895 = vrcp.f32 %v485_v18  ;;  %v567_v44 = vadd.f32 %v566_v22, %v523_v10  ;;  %v550_v45 = vrot.slane %v549_v40, 2 }
 0x172   : > { %v514_v21 = vrot.slane %v513_v36, 1  ;;  %v533_v49 = vadd.f32 %v532_v57, %v531_v13  ;;  %v556_v50 = vrot.slane %v555_v58, 2  ;;  %v539_v51 = vadd.f32 %v538_v30, %v537_v17 }
 0x173   : > { %v491_v20 = vadd.f32 %v490_v38, %v489_v54  ;;  %v562_v33 = vrot.slane %v561_v31, 2  ;;  %v528_v27 = vrot.slane %v527_v24, 1  ;;  %v545_v46 = vadd.f32 %v544_v43, %v543_v47 }
 0x174   : > { %v515_v32 = vadd.f32 %v514_v21, %v513_v36  ;;  %v568_v52 = vrot.slane %v567_v44, 2  ;;  %v551_v34 = vadd.f32 %v550_v45, %v549_v40  ;;  %v534_v41 = vrot.slane %v533_v49, 1 }
 0x175   : > { %897 = vrcp.f32 %v491_v20  ;;  %v557_v42 = vadd.f32 %v556_v50, %v555_v58  ;;  %v540_v55 = vrot.slane %v539_v51, 1  ;;  %v563_v7 = vadd.f32 %v562_v33, %v561_v31 }
 0x176   : > { %899 = vrcp.f32 %v497_v23  ;;  %v529_v8 = vadd.f32 %v528_v27, %v527_v24  ;;  %v546_v56 = vrot.slane %v545_v46, 1  ;;  %v569_v25 = vadd.f32 %v568_v52, %v567_v44 }
 0x177   : > { %901 = vrcp.f32 %v503_v28  ;;  %v552_v26 = vrot.slane %v551_v34, 1  ;;  %v535_v60 = vadd.f32 %v534_v41, %v533_v49  ;;  %v558_v61 = vrot.slane %v557_v42, 1 }
 0x178   : > { %903 = vrcp.f32 %v509_v29  ;;  %v541_v0 = vadd.f32 %v540_v55, %v539_v51  ;;  %v564_v35 = vrot.slane %v563_v7, 1  ;;  %v547_v2 = vadd.f32 %v546_v56, %v545_v46 }
 0x179   : > { %905 = vrcp.f32 %v515_v32  ;;  %v570_v3 = vrot.slane %v569_v25, 1  ;;  %v553_v37 = vadd.f32 %v552_v26, %v551_v34  ;;  %v559_v53 = vadd.f32 %v558_v61, %v557_v42 }
 0x17a   : > { %v892_v59 = vpop.eup %891  ;;  %v565_v12 = vadd.f32 %v564_v35, %v563_v7 }
 0x17b   : > { %v580_v62 = vmul.f32 %v892_v59, %v529_v8  ;;  %v571_v15 = vadd.f32 %v570_v3, %v569_v25 }
 0x17c   : > { %v894_v63 = vpop.eup %893 }
 0x17d   : > { %v581_v4 = vmul.f32 %v894_v63, %v535_v60  ;;  %v588_v54 = vmul.f32 %v580_v62, %v580_v62 }
 0x17e   : > { %v896_v1 = vpop.eup %895 }
 0x17f   : > { %v582_v6 = vmul.f32 %v896_v1, %v541_v0  ;;  %v589_v10 = vmul.f32 %v581_v4, %v581_v4 }
 0x181   : > { %v590_v13 = vmul.f32 %v582_v6, %v582_v6  ;;  %v605_v17 = vsel %vm604_vm0, %v589_v10, %v588_v54 }
 0x182   : > { %v898_v5 = vpop.eup %897 }
 0x183   : > { %v900_v9 = vpop.eup %899  ;;  %v583_v39 = vmul.f32 %v898_v5, %v547_v2  ;;  %v607_v19 = vsel %vm606_vm1, %v590_v13, %v605_v17 }
 0x184   : > { %v902_v48 = vpop.eup %901  ;;  %v584_v36 = vmul.f32 %v900_v9, %v553_v37 }
 0x185   : > { %v904_v14 = vpop.eup %903  ;;  %v585_v38 = vmul.f32 %v902_v48, %v559_v53  ;;  %v591_v16 = vmul.f32 %v583_v39, %v583_v39 }
 0x186   : > { %v906_v18 = vpop.eup %905  ;;  %v586_v11 = vmul.f32 %v904_v14, %v565_v12  ;;  %v592_v47 = vmul.f32 %v584_v36, %v584_v36 }
 0x187   : > { %v587_v20 = vmul.f32 %v906_v18, %v571_v15  ;;  %v593_v21 = vmul.f32 %v585_v38, %v585_v38  ;;  %v609_v22 = vsel %vm608_vm2, %v591_v16, %v607_v19 }
 0x188   : > { %v594_v23 = vmul.f32 %v586_v11, %v586_v11  ;;  %v611_v24 = vsel %vm610_vm3, %v592_v47, %v609_v22 }
 0x189   : > { %v595_v40 = vmul.f32 %v587_v20, %v587_v20  ;;  %v613_v28 = vsel %vm612_vm4, %v593_v21, %v611_v24 }
 0x18a   : > { %v615_v57 = vsel %vm614_vm5, %v594_v23, %v613_v28 }
 0x18b   : > { %v617_v58 = vsel %vm616_vm6, %v595_v40, %v615_v57 }
 0x18c   : > { %619 = vadd.xlane.f32.xlu0 %v617_v58 }
 0x215   : > { %v620_v29 = vpop.xlane.xlu0 %619 }
 0x216   : > { %v621_v30 = vmax.f32 %v620_v29, 1e-24 }
 0x218   : > { %907 = vrsqrt.f32 %v621_v30 }
 0x225   : > { %v908_v31 = vpop.eup %907 }
 0x226   : > { %v624_v32 = vrot.slane %v908_v31, 1  ;;  %v625_v43 = vrot.slane %v908_v31, 2  ;;  %v626_v44 = vrot.slane %v908_v31, 3  ;;  %v627_v45 = vrot.slane %v908_v31, 4 }
 0x227   : > { %v628_v49 = vrot.slane %v908_v31, 5  ;;  %v629_v50 = vrot.slane %v908_v31, 6  ;;  %v630_v51 = vrot.slane %v908_v31, 7  ;;  %v639_v34 = vmul.f32 %v908_v31, %v580_v62 }
 0x228   : > { %v640_v33 = vmul.f32 %v624_v32, %v581_v4  ;;  %v641_v27 = vmul.f32 %v625_v43, %v582_v6  ;;  %v642_v46 = vmul.f32 %v626_v44, %v583_v39  ;;  %v643_v52 = vmul.f32 %v627_v45, %v584_v36 }
 0x229   : > { %v644_v41 = vmul.f32 %v628_v49, %v585_v38  ;;  %v645_v7 = vmul.f32 %v629_v50, %v586_v11  ;;  %v646_v8 = vmul.f32 %v630_v51, %v587_v20 }
 0x22a   : > { %v655_v42 = vrot.slane %v640_v33, 7  ;;  %v657_v55 = vrot.slane %v641_v27, 6  ;;  %v659_v25 = vrot.slane %v642_v46, 5  ;;  %v661_v26 = vrot.slane %v643_v52, 4 }
 0x22b   : > { %v663_v61 = vrot.slane %v644_v41, 3  ;;  %v665_v63 = vrot.slane %v645_v7, 2  ;;  %v667_v35 = vrot.slane %v646_v8, 1 }
 0x22c   : > { %v656_v56 = vsel %vm604_vm0, %v655_v42, %v639_v34 }
 0x22d   : > { %v658_v59 = vsel %vm606_vm1, %v657_v55, %v656_v56 }
 0x22e   : > { %v660_v60 = vsel %vm608_vm2, %v659_v25, %v658_v59 }
 0x22f   : > { %v662_v62 = vsel %vm610_vm3, %v661_v26, %v660_v60 }
 0x230   : > { %v664_v0 = vsel %vm612_vm4, %v663_v61, %v662_v62 }
 0x231   : > { %v666_v1 = vsel %vm614_vm5, %v665_v63, %v664_v0 }
 0x232   : > { %v668_v2 = vsel %vm616_vm6, %v667_v35, %v666_v1 }
 0x233   : > { %670 = vst [vmem:[%s176_s8] sm:$0xff] %v668_v2 }
 0x234   : > { %976 = shalt.err (!%p973_p0)
}
 0x235   : > { %s977_s4 = scalar_lea.hbm %s1278_s25, 128  ;;  %s981_s7 = scalar_lea.hbm %s1318_s2, 256 }
 0x236   : > { %p978_p5 = scmp.ne.s32.totalorder %s1278_s25, %s977_s4  ;;  %p982_p4 = scmp.lt.s32.totalorder %s1278_s25, %s1318_s2 }
 0x237   : > { %p983_p6 = scmp.lt.s32.totalorder %s981_s7, %s977_s4 }
 0x238   : > { %p979_p9 = pnand %p978_p5, %p1334_p11 }
 0x239   : > { %p984_p8 = por %p983_p6, %p982_p4 }
 0x23a   : > { %p980_p1 = pneg %p979_p9 }
 0x23c   : > { %p985_p3 = pnand %p984_p8, %p980_p1 }
 0x23e   : > { %988 = shalt.err (!%p985_p3)
}
 0x23f   : > { %819 = dma.vmem_to_hbm [thread:$0]  (%p1334_p11), %s686_s18, 128, %s1278_s25, %s672_s13  }
 0x240 PF: > { %s697_s23 = sand.u32 1, %s1019_s9   ;;  %p1335_p7 = scmp.ne.s32.totalorder %s1324_s16, 0 }
 0x241   : > { %p1336_p12 = scmp.ge.s32.totalorder %s1031_s12, 2  ;;  %s698_s24 = scalar_lea.sflag [#allocation4], %s697_s23 }
 0x243   : > { %p830_p10 = pnand %p1336_p12, %p1335_p7 }
 0x245   : > { %p831_p2 = pneg %p830_p10 }
 0x247   : > { %1014 = dma.done.wait (%p831_p2), %s698_s24, 128  }
 0x248   : > { %1016 = vsyncadd (%p831_p2), %s698_s24, 4294967168  ;;  %p16_p13 = scmp.ge.s32.totalorder %s1110_s21, 4   ;;  %s1337_s9 = smov %s1023_s10 }
 0x249   : > { %s1338_s10 = smov %s1027_s11  ;;  %s1339_s11 = smov %s1127_s29 }
 0x24a   : > { %s1340_s12 = smov %s1110_s21  ;;  %18 = sbr.rel (!%p16_p13) target bundleno = 6 (0x6), region = 77 }
 0x24f   :  { %703 = vsyncpa [#allocation3], 1 }
 0x250   :  { %705 = vsyncpa [#allocation3 + $0x1], 1 }
 0x251   :  { %706 = vsyncpa [#allocation6], 1 }
 0x252   :  { %707 = vsyncpa [#allocation4], 1 }
 0x253   :  { %709 = vsyncpa [#allocation4 + $0x1], 1 }

</bundles_post_ra>
